<compile_context>
chip_gen: v7x
topology: tpu7x:2x2x1
jax: 0.10.0
libtpu: 0.0.40
codegen_flags: <defaults>
</compile_context>

<pallas_src>
import math

import jax
import jax.numpy as jnp
from jax import lax
from jax.experimental import pallas as pl
from jax.experimental.pallas import tpu as pltpu


def _encoder_kernel(x_ref, w_ih_ref, w_hh_ref, b_ref, w_lin_ref, b_lin_ref,
                    out_ref):
    """Full GRU recurrence + fused output Linear in one kernel invocation.

    x_ref     : (S, B, I)  input sequence (seq-major)
    w_ih_ref  : (3, I, H)  gate-major input weights  (r, z, n), pre-transposed
    w_hh_ref  : (3, H, H)  gate-major hidden weights (r, z, n), pre-transposed
    b_ref     : (4, 1, H)  [b_ir+b_hr, b_iz+b_hz, b_in, b_hn]
    w_lin_ref : (H, O)     Linear weight, pre-transposed
    b_lin_ref : (1, O)     Linear bias
    out_ref   : (S, B, O)
    """
    S, B, _ = x_ref.shape
    O = w_lin_ref.shape[-1]

    # ---- Prologue: input projection for all S steps (off the serial chain) --
    x_all = x_ref[...].reshape(S * B, x_ref.shape[-1])               # (S*B, I)
    b_r, b_z, b_in, b_hn = b_ref[0], b_ref[1], b_ref[2], b_ref[3]    # (1, H)
    gi_r = jnp.dot(x_all, w_ih_ref[0], preferred_element_type=jnp.float32) + b_r
    gi_z = jnp.dot(x_all, w_ih_ref[1], preferred_element_type=jnp.float32) + b_z
    gi_n = jnp.dot(x_all, w_ih_ref[2], preferred_element_type=jnp.float32) + b_in

    w_hr, w_hz, w_hn = w_hh_ref[0], w_hh_ref[1], w_hh_ref[2]         # (H, H)

    # ---- Recurrence: fully unrolled static loop, h carried in vregs ---------
    hs = []
    # t = 0: h_{-1} == 0, so the hidden-side matmuls vanish.
    r = jax.nn.sigmoid(gi_r[0:B])
    z = jax.nn.sigmoid(gi_z[0:B])
    n = jnp.tanh(gi_n[0:B] + r * b_hn)
    h = (1.0 - z) * n
    hs.append(h)

    for t in range(1, S):
        sl = slice(t * B, (t + 1) * B)
        gh_r = jnp.dot(h, w_hr, preferred_element_type=jnp.float32)
        gh_z = jnp.dot(h, w_hz, preferred_element_type=jnp.float32)
        gh_n = jnp.dot(h, w_hn, preferred_element_type=jnp.float32)
        r = jax.nn.sigmoid(gi_r[sl] + gh_r)
        z = jax.nn.sigmoid(gi_z[sl] + gh_z)
        n = jnp.tanh(gi_n[sl] + r * (gh_n + b_hn))
        h = (1.0 - z) * n + z * h
        hs.append(h)

    # ---- Epilogue: one fused Linear over all hidden states + one store ------
    h_all = jnp.concatenate(hs, axis=0)                              # (S*B, H)
    y = jnp.dot(h_all, w_lin_ref[...], preferred_element_type=jnp.float32) \
        + b_lin_ref[...]                                             # (S*B, O)
    out_ref[...] = y.reshape(S, B, O).astype(out_ref.dtype)


def pack_params(params):
    """PyTorch-layout GRU/Linear params -> kernel layout (gate-major, transposed,
    r/z biases pre-summed)."""
    w_ih, w_hh, b_ih, b_hh, w_lin, b_lin = params
    H = w_hh.shape[1]
    I = w_ih.shape[1]
    w_ih_g = jnp.transpose(w_ih.reshape(3, H, I), (0, 2, 1))         # (3, I, H)
    w_hh_g = jnp.transpose(w_hh.reshape(3, H, H), (0, 2, 1))         # (3, H, H)
    b_i = b_ih.reshape(3, 1, H)
    b_h = b_hh.reshape(3, 1, H)
    b_gates = jnp.concatenate(
        [b_i[0:1] + b_h[0:1],        # r-gate bias (pre-summed)
         b_i[1:2] + b_h[1:2],        # z-gate bias (pre-summed)
         b_i[2:3],                   # b_in
         b_h[2:3]],                  # b_hn (kept separate: scaled by r)
        axis=0)                                                       # (4, 1, H)
    return w_ih_g, w_hh_g, b_gates, w_lin.T, b_lin.reshape(1, -1)


@jax.jit
def encoder_forward(x, params):
    """x: (S, B, I) float32, seq-major (matches nn.GRU batch_first=False).
    params: PyTorch layout — w_ih (3H, I), w_hh (3H, H), b_ih (3H,), b_hh (3H,),
            w_lin (O, H), b_lin (O,).  Returns (S, B, O) float32."""
    S, B, _ = x.shape
    w_ih_g, w_hh_g, b_gates, w_lin_t, b_lin_2d = pack_params(params)
    O = w_lin_t.shape[-1]

    vmem_spec = pl.BlockSpec(memory_space=pltpu.MemorySpace.VMEM)
    return pl.pallas_call(
        _encoder_kernel,
        out_shape=jax.ShapeDtypeStruct((S, B, O), jnp.float32),
        in_specs=[vmem_spec] * 6,
        out_specs=vmem_spec,
    )(x, w_ih_g, w_hh_g, b_gates, w_lin_t, b_lin_2d)


def init_params(key, input_size, hidden_size, output_size):
    """PyTorch-style uniform(-1/sqrt(H), 1/sqrt(H)) init in PyTorch layout."""
    ks = jax.random.split(key, 6)
    bound = 1.0 / math.sqrt(hidden_size)
    u = lambda k, shape: jax.random.uniform(k, shape, jnp.float32, -bound, bound)
    w_ih = u(ks[0], (3 * hidden_size, input_size))    # weight_ih_l0
    w_hh = u(ks[1], (3 * hidden_size, hidden_size))   # weight_hh_l0
    b_ih = u(ks[2], (3 * hidden_size,))
    b_hh = u(ks[3], (3 * hidden_size,))
    w_lin = u(ks[4], (output_size, hidden_size))      # nn.Linear weight
    b_lin = u(ks[5], (output_size,))
    return w_ih, w_hh, b_ih, b_hh, w_lin, b_lin


def encoder_reference(x, params):
    """Pure-JAX reference reproducing PyTorch GRU (r, z, n gates) + Linear."""
    w_ih, w_hh, b_ih, b_hh, w_lin, b_lin = params
    H = w_hh.shape[1]
    B = x.shape[1]

    def step(h, x_t):
        gi = x_t @ w_ih.T + b_ih
        gh = h @ w_hh.T + b_hh
        r = jax.nn.sigmoid(gi[:, :H] + gh[:, :H])
        z = jax.nn.sigmoid(gi[:, H:2 * H] + gh[:, H:2 * H])
        n = jnp.tanh(gi[:, 2 * H:] + r * gh[:, 2 * H:])
        h_new = (1.0 - z) * n + z * h
        return h_new, h_new @ w_lin.T + b_lin

    h0 = jnp.zeros((B, H), jnp.float32)
    _, ys = lax.scan(step, h0, x)
    return ys


if __name__ == "__main__":
    # Shapes consistent with a cartpole behavior-cloning encoder:
    # input_size = 4 (state dim), hidden_size = 32, output_size = 2, seq = 8.
    S, B, I, H, O = 8, 4, 4, 32, 2

    key = jax.random.PRNGKey(0)
    k_x, k_p = jax.random.split(key)
    params = init_params(k_p, I, H, O)
    x = jax.random.normal(k_x, (S, B, I), jnp.float32)

    out = encoder_forward(x, params)
    out = jax.block_until_ready(out)

    ref = encoder_reference(x, params)
    assert out.shape == (S, B, O)
    err = jnp.max(jnp.abs(out - ref))
    assert jnp.allclose(out, ref, atol=1e-5, rtol=1e-5), f"max abs err {err}"

    print("KERNEL_OK")
</pallas_src>

<mosaic_0001>
module attributes {stable_mosaic.version = 11 : i64} {
  func.func @_encoder_kernel(%arg0: memref<8x4x4xf32, #tpu.memory_space<vmem>>, %arg1: memref<3x4x32xf32, #tpu.memory_space<vmem>>, %arg2: memref<3x32x32xf32, #tpu.memory_space<vmem>>, %arg3: memref<4x1x32xf32, #tpu.memory_space<vmem>>, %arg4: memref<32x2xf32, #tpu.memory_space<vmem>>, %arg5: memref<1x2xf32, #tpu.memory_space<vmem>>, %arg6: memref<8x4x2xf32, #tpu.memory_space<vmem>>) attributes {dimension_semantics = [], scalar_prefetch = 0 : i64, scratch_operands = 0 : i64, tpu.core_type = #tpu.core_type<tc>} {
    %c0 = arith.constant 0 : index
    %c0_0 = arith.constant 0 : index
    %c0_1 = arith.constant 0 : index
    %0 = vector.load %arg0[%c0, %c0_0, %c0_1] : memref<8x4x4xf32, #tpu.memory_space<vmem>>, vector<8x4x4xf32>
    %1 = vector.shape_cast %0 : vector<8x4x4xf32> to vector<32x4xf32>
    %c0_2 = arith.constant 0 : index
    %c0_3 = arith.constant 0 : index
    %c0_4 = arith.constant 0 : index
    %2 = vector.load %arg3[%c0_2, %c0_3, %c0_4] : memref<4x1x32xf32, #tpu.memory_space<vmem>>, vector<1x1x32xf32>
    %3 = vector.shape_cast %2 : vector<1x1x32xf32> to vector<1x32xf32>
    %c1 = arith.constant 1 : index
    %c0_5 = arith.constant 0 : index
    %c0_6 = arith.constant 0 : index
    %4 = vector.load %arg3[%c1, %c0_5, %c0_6] : memref<4x1x32xf32, #tpu.memory_space<vmem>>, vector<1x1x32xf32>
    %5 = vector.shape_cast %4 : vector<1x1x32xf32> to vector<1x32xf32>
    %c2 = arith.constant 2 : index
    %c0_7 = arith.constant 0 : index
    %c0_8 = arith.constant 0 : index
    %6 = vector.load %arg3[%c2, %c0_7, %c0_8] : memref<4x1x32xf32, #tpu.memory_space<vmem>>, vector<1x1x32xf32>
    %7 = vector.shape_cast %6 : vector<1x1x32xf32> to vector<1x32xf32>
    %c3 = arith.constant 3 : index
    %c0_9 = arith.constant 0 : index
    %c0_10 = arith.constant 0 : index
    %8 = vector.load %arg3[%c3, %c0_9, %c0_10] : memref<4x1x32xf32, #tpu.memory_space<vmem>>, vector<1x1x32xf32>
    %9 = vector.shape_cast %8 : vector<1x1x32xf32> to vector<1x32xf32>
    %c0_11 = arith.constant 0 : index
    %c0_12 = arith.constant 0 : index
    %c0_13 = arith.constant 0 : index
    %10 = vector.load %arg1[%c0_11, %c0_12, %c0_13] : memref<3x4x32xf32, #tpu.memory_space<vmem>>, vector<1x4x32xf32>
    %11 = vector.shape_cast %10 : vector<1x4x32xf32> to vector<4x32xf32>
    %cst = arith.constant dense<0.000000e+00> : vector<32x32xf32>
    %12 = tpu.matmul %1, %11, %cst {dimension_numbers = #tpu.dot_dimension_numbers<[1], [0], [0], [1], [0, 0, 1, 1], [], []>} : vector<32x4xf32>, vector<4x32xf32>, vector<32x32xf32> -> vector<32x32xf32>
    %13 = vector.broadcast %3 : vector<1x32xf32> to vector<32x32xf32>
    %14 = arith.addf %12, %13 : vector<32x32xf32>
    %c1_14 = arith.constant 1 : index
    %c0_15 = arith.constant 0 : index
    %c0_16 = arith.constant 0 : index
    %15 = vector.load %arg1[%c1_14, %c0_15, %c0_16] : memref<3x4x32xf32, #tpu.memory_space<vmem>>, vector<1x4x32xf32>
    %16 = vector.shape_cast %15 : vector<1x4x32xf32> to vector<4x32xf32>
    %cst_17 = arith.constant dense<0.000000e+00> : vector<32x32xf32>
    %17 = tpu.matmul %1, %16, %cst_17 {dimension_numbers = #tpu.dot_dimension_numbers<[1], [0], [0], [1], [0, 0, 1, 1], [], []>} : vector<32x4xf32>, vector<4x32xf32>, vector<32x32xf32> -> vector<32x32xf32>
    %18 = vector.broadcast %5 : vector<1x32xf32> to vector<32x32xf32>
    %19 = arith.addf %17, %18 : vector<32x32xf32>
    %c2_18 = arith.constant 2 : index
    %c0_19 = arith.constant 0 : index
    %c0_20 = arith.constant 0 : index
    %20 = vector.load %arg1[%c2_18, %c0_19, %c0_20] : memref<3x4x32xf32, #tpu.memory_space<vmem>>, vector<1x4x32xf32>
    %21 = vector.shape_cast %20 : vector<1x4x32xf32> to vector<4x32xf32>
    %cst_21 = arith.constant dense<0.000000e+00> : vector<32x32xf32>
    %22 = tpu.matmul %1, %21, %cst_21 {dimension_numbers = #tpu.dot_dimension_numbers<[1], [0], [0], [1], [0, 0, 1, 1], [], []>} : vector<32x4xf32>, vector<4x32xf32>, vector<32x32xf32> -> vector<32x32xf32>
    %23 = vector.broadcast %7 : vector<1x32xf32> to vector<32x32xf32>
    %24 = arith.addf %22, %23 : vector<32x32xf32>
    %c0_22 = arith.constant 0 : index
    %c0_23 = arith.constant 0 : index
    %c0_24 = arith.constant 0 : index
    %25 = vector.load %arg2[%c0_22, %c0_23, %c0_24] : memref<3x32x32xf32, #tpu.memory_space<vmem>>, vector<1x32x32xf32>
    %26 = vector.shape_cast %25 : vector<1x32x32xf32> to vector<32x32xf32>
    %c1_25 = arith.constant 1 : index
    %c0_26 = arith.constant 0 : index
    %c0_27 = arith.constant 0 : index
    %27 = vector.load %arg2[%c1_25, %c0_26, %c0_27] : memref<3x32x32xf32, #tpu.memory_space<vmem>>, vector<1x32x32xf32>
    %28 = vector.shape_cast %27 : vector<1x32x32xf32> to vector<32x32xf32>
    %c2_28 = arith.constant 2 : index
    %c0_29 = arith.constant 0 : index
    %c0_30 = arith.constant 0 : index
    %29 = vector.load %arg2[%c2_28, %c0_29, %c0_30] : memref<3x32x32xf32, #tpu.memory_space<vmem>>, vector<1x32x32xf32>
    %30 = vector.shape_cast %29 : vector<1x32x32xf32> to vector<32x32xf32>
    %31 = vector.extract_strided_slice %14 {offsets = [0, 0], sizes = [4, 32], strides = [1, 1]} : vector<32x32xf32> to vector<4x32xf32>
    %32 = arith.negf %31 : vector<4x32xf32>
    %33 = math.exp %32 : vector<4x32xf32>
    %cst_31 = arith.constant 1.000000e+00 : f32
    %34 = vector.broadcast %cst_31 : f32 to vector<4x32xf32>
    %35 = arith.addf %34, %33 : vector<4x32xf32>
    %36 = arith.divf %34, %35 : vector<4x32xf32>
    %37 = vector.extract_strided_slice %19 {offsets = [0, 0], sizes = [4, 32], strides = [1, 1]} : vector<32x32xf32> to vector<4x32xf32>
    %38 = arith.negf %37 : vector<4x32xf32>
    %39 = math.exp %38 : vector<4x32xf32>
    %cst_32 = arith.constant 1.000000e+00 : f32
    %40 = vector.broadcast %cst_32 : f32 to vector<4x32xf32>
    %41 = arith.addf %40, %39 : vector<4x32xf32>
    %42 = arith.divf %40, %41 : vector<4x32xf32>
    %43 = vector.extract_strided_slice %24 {offsets = [0, 0], sizes = [4, 32], strides = [1, 1]} : vector<32x32xf32> to vector<4x32xf32>
    %44 = vector.broadcast %9 : vector<1x32xf32> to vector<4x32xf32>
    %45 = arith.mulf %36, %44 : vector<4x32xf32>
    %46 = arith.addf %43, %45 : vector<4x32xf32>
    %47 = math.tanh %46 : vector<4x32xf32>
    %cst_33 = arith.constant 1.000000e+00 : f32
    %48 = vector.broadcast %cst_33 : f32 to vector<4x32xf32>
    %49 = arith.subf %48, %42 : vector<4x32xf32>
    %50 = arith.mulf %49, %47 : vector<4x32xf32>
    %cst_34 = arith.constant dense<0.000000e+00> : vector<4x32xf32>
    %51 = tpu.matmul %50, %26, %cst_34 {dimension_numbers = #tpu.dot_dimension_numbers<[1], [0], [0], [1], [0, 0, 1, 1], [], []>} : vector<4x32xf32>, vector<32x32xf32>, vector<4x32xf32> -> vector<4x32xf32>
    %cst_35 = arith.constant dense<0.000000e+00> : vector<4x32xf32>
    %52 = tpu.matmul %50, %28, %cst_35 {dimension_numbers = #tpu.dot_dimension_numbers<[1], [0], [0], [1], [0, 0, 1, 1], [], []>} : vector<4x32xf32>, vector<32x32xf32>, vector<4x32xf32> -> vector<4x32xf32>
    %cst_36 = arith.constant dense<0.000000e+00> : vector<4x32xf32>
    %53 = tpu.matmul %50, %30, %cst_36 {dimension_numbers = #tpu.dot_dimension_numbers<[1], [0], [0], [1], [0, 0, 1, 1], [], []>} : vector<4x32xf32>, vector<32x32xf32>, vector<4x32xf32> -> vector<4x32xf32>
    %54 = vector.extract_strided_slice %14 {offsets = [4, 0], sizes = [4, 32], strides = [1, 1]} : vector<32x32xf32> to vector<4x32xf32>
    %55 = arith.addf %54, %51 : vector<4x32xf32>
    %56 = arith.negf %55 : vector<4x32xf32>
    %57 = math.exp %56 : vector<4x32xf32>
    %cst_37 = arith.constant 1.000000e+00 : f32
    %58 = vector.broadcast %cst_37 : f32 to vector<4x32xf32>
    %59 = arith.addf %58, %57 : vector<4x32xf32>
    %60 = arith.divf %58, %59 : vector<4x32xf32>
    %61 = vector.extract_strided_slice %19 {offsets = [4, 0], sizes = [4, 32], strides = [1, 1]} : vector<32x32xf32> to vector<4x32xf32>
    %62 = arith.addf %61, %52 : vector<4x32xf32>
    %63 = arith.negf %62 : vector<4x32xf32>
    %64 = math.exp %63 : vector<4x32xf32>
    %cst_38 = arith.constant 1.000000e+00 : f32
    %65 = vector.broadcast %cst_38 : f32 to vector<4x32xf32>
    %66 = arith.addf %65, %64 : vector<4x32xf32>
    %67 = arith.divf %65, %66 : vector<4x32xf32>
    %68 = vector.extract_strided_slice %24 {offsets = [4, 0], sizes = [4, 32], strides = [1, 1]} : vector<32x32xf32> to vector<4x32xf32>
    %69 = vector.broadcast %9 : vector<1x32xf32> to vector<4x32xf32>
    %70 = arith.addf %53, %69 : vector<4x32xf32>
    %71 = arith.mulf %60, %70 : vector<4x32xf32>
    %72 = arith.addf %68, %71 : vector<4x32xf32>
    %73 = math.tanh %72 : vector<4x32xf32>
    %cst_39 = arith.constant 1.000000e+00 : f32
    %74 = vector.broadcast %cst_39 : f32 to vector<4x32xf32>
    %75 = arith.subf %74, %67 : vector<4x32xf32>
    %76 = arith.mulf %75, %73 : vector<4x32xf32>
    %77 = arith.mulf %67, %50 : vector<4x32xf32>
    %78 = arith.addf %76, %77 : vector<4x32xf32>
    %cst_40 = arith.constant dense<0.000000e+00> : vector<4x32xf32>
    %79 = tpu.matmul %78, %26, %cst_40 {dimension_numbers = #tpu.dot_dimension_numbers<[1], [0], [0], [1], [0, 0, 1, 1], [], []>} : vector<4x32xf32>, vector<32x32xf32>, vector<4x32xf32> -> vector<4x32xf32>
    %cst_41 = arith.constant dense<0.000000e+00> : vector<4x32xf32>
    %80 = tpu.matmul %78, %28, %cst_41 {dimension_numbers = #tpu.dot_dimension_numbers<[1], [0], [0], [1], [0, 0, 1, 1], [], []>} : vector<4x32xf32>, vector<32x32xf32>, vector<4x32xf32> -> vector<4x32xf32>
    %cst_42 = arith.constant dense<0.000000e+00> : vector<4x32xf32>
    %81 = tpu.matmul %78, %30, %cst_42 {dimension_numbers = #tpu.dot_dimension_numbers<[1], [0], [0], [1], [0, 0, 1, 1], [], []>} : vector<4x32xf32>, vector<32x32xf32>, vector<4x32xf32> -> vector<4x32xf32>
    %82 = vector.extract_strided_slice %14 {offsets = [8, 0], sizes = [4, 32], strides = [1, 1]} : vector<32x32xf32> to vector<4x32xf32>
    %83 = arith.addf %82, %79 : vector<4x32xf32>
    %84 = arith.negf %83 : vector<4x32xf32>
    %85 = math.exp %84 : vector<4x32xf32>
    %cst_43 = arith.constant 1.000000e+00 : f32
    %86 = vector.broadcast %cst_43 : f32 to vector<4x32xf32>
    %87 = arith.addf %86, %85 : vector<4x32xf32>
    %88 = arith.divf %86, %87 : vector<4x32xf32>
    %89 = vector.extract_strided_slice %19 {offsets = [8, 0], sizes = [4, 32], strides = [1, 1]} : vector<32x32xf32> to vector<4x32xf32>
    %90 = arith.addf %89, %80 : vector<4x32xf32>
    %91 = arith.negf %90 : vector<4x32xf32>
    %92 = math.exp %91 : vector<4x32xf32>
    %cst_44 = arith.constant 1.000000e+00 : f32
    %93 = vector.broadcast %cst_44 : f32 to vector<4x32xf32>
    %94 = arith.addf %93, %92 : vector<4x32xf32>
    %95 = arith.divf %93, %94 : vector<4x32xf32>
    %96 = vector.extract_strided_slice %24 {offsets = [8, 0], sizes = [4, 32], strides = [1, 1]} : vector<32x32xf32> to vector<4x32xf32>
    %97 = vector.broadcast %9 : vector<1x32xf32> to vector<4x32xf32>
    %98 = arith.addf %81, %97 : vector<4x32xf32>
    %99 = arith.mulf %88, %98 : vector<4x32xf32>
    %100 = arith.addf %96, %99 : vector<4x32xf32>
    %101 = math.tanh %100 : vector<4x32xf32>
    %cst_45 = arith.constant 1.000000e+00 : f32
    %102 = vector.broadcast %cst_45 : f32 to vector<4x32xf32>
    %103 = arith.subf %102, %95 : vector<4x32xf32>
    %104 = arith.mulf %103, %101 : vector<4x32xf32>
    %105 = arith.mulf %95, %78 : vector<4x32xf32>
    %106 = arith.addf %104, %105 : vector<4x32xf32>
    %cst_46 = arith.constant dense<0.000000e+00> : vector<4x32xf32>
    %107 = tpu.matmul %106, %26, %cst_46 {dimension_numbers = #tpu.dot_dimension_numbers<[1], [0], [0], [1], [0, 0, 1, 1], [], []>} : vector<4x32xf32>, vector<32x32xf32>, vector<4x32xf32> -> vector<4x32xf32>
    %cst_47 = arith.constant dense<0.000000e+00> : vector<4x32xf32>
    %108 = tpu.matmul %106, %28, %cst_47 {dimension_numbers = #tpu.dot_dimension_numbers<[1], [0], [0], [1], [0, 0, 1, 1], [], []>} : vector<4x32xf32>, vector<32x32xf32>, vector<4x32xf32> -> vector<4x32xf32>
    %cst_48 = arith.constant dense<0.000000e+00> : vector<4x32xf32>
    %109 = tpu.matmul %106, %30, %cst_48 {dimension_numbers = #tpu.dot_dimension_numbers<[1], [0], [0], [1], [0, 0, 1, 1], [], []>} : vector<4x32xf32>, vector<32x32xf32>, vector<4x32xf32> -> vector<4x32xf32>
    %110 = vector.extract_strided_slice %14 {offsets = [12, 0], sizes = [4, 32], strides = [1, 1]} : vector<32x32xf32> to vector<4x32xf32>
    %111 = arith.addf %110, %107 : vector<4x32xf32>
    %112 = arith.negf %111 : vector<4x32xf32>
    %113 = math.exp %112 : vector<4x32xf32>
    %cst_49 = arith.constant 1.000000e+00 : f32
    %114 = vector.broadcast %cst_49 : f32 to vector<4x32xf32>
    %115 = arith.addf %114, %113 : vector<4x32xf32>
    %116 = arith.divf %114, %115 : vector<4x32xf32>
    %117 = vector.extract_strided_slice %19 {offsets = [12, 0], sizes = [4, 32], strides = [1, 1]} : vector<32x32xf32> to vector<4x32xf32>
    %118 = arith.addf %117, %108 : vector<4x32xf32>
    %119 = arith.negf %118 : vector<4x32xf32>
    %120 = math.exp %119 : vector<4x32xf32>
    %cst_50 = arith.constant 1.000000e+00 : f32
    %121 = vector.broadcast %cst_50 : f32 to vector<4x32xf32>
    %122 = arith.addf %121, %120 : vector<4x32xf32>
    %123 = arith.divf %121, %122 : vector<4x32xf32>
    %124 = vector.extract_strided_slice %24 {offsets = [12, 0], sizes = [4, 32], strides = [1, 1]} : vector<32x32xf32> to vector<4x32xf32>
    %125 = vector.broadcast %9 : vector<1x32xf32> to vector<4x32xf32>
    %126 = arith.addf %109, %125 : vector<4x32xf32>
    %127 = arith.mulf %116, %126 : vector<4x32xf32>
    %128 = arith.addf %124, %127 : vector<4x32xf32>
    %129 = math.tanh %128 : vector<4x32xf32>
    %cst_51 = arith.constant 1.000000e+00 : f32
    %130 = vector.broadcast %cst_51 : f32 to vector<4x32xf32>
    %131 = arith.subf %130, %123 : vector<4x32xf32>
    %132 = arith.mulf %131, %129 : vector<4x32xf32>
    %133 = arith.mulf %123, %106 : vector<4x32xf32>
    %134 = arith.addf %132, %133 : vector<4x32xf32>
    %cst_52 = arith.constant dense<0.000000e+00> : vector<4x32xf32>
    %135 = tpu.matmul %134, %26, %cst_52 {dimension_numbers = #tpu.dot_dimension_numbers<[1], [0], [0], [1], [0, 0, 1, 1], [], []>} : vector<4x32xf32>, vector<32x32xf32>, vector<4x32xf32> -> vector<4x32xf32>
    %cst_53 = arith.constant dense<0.000000e+00> : vector<4x32xf32>
    %136 = tpu.matmul %134, %28, %cst_53 {dimension_numbers = #tpu.dot_dimension_numbers<[1], [0], [0], [1], [0, 0, 1, 1], [], []>} : vector<4x32xf32>, vector<32x32xf32>, vector<4x32xf32> -> vector<4x32xf32>
    %cst_54 = arith.constant dense<0.000000e+00> : vector<4x32xf32>
    %137 = tpu.matmul %134, %30, %cst_54 {dimension_numbers = #tpu.dot_dimension_numbers<[1], [0], [0], [1], [0, 0, 1, 1], [], []>} : vector<4x32xf32>, vector<32x32xf32>, vector<4x32xf32> -> vector<4x32xf32>
    %138 = vector.extract_strided_slice %14 {offsets = [16, 0], sizes = [4, 32], strides = [1, 1]} : vector<32x32xf32> to vector<4x32xf32>
    %139 = arith.addf %138, %135 : vector<4x32xf32>
    %140 = arith.negf %139 : vector<4x32xf32>
    %141 = math.exp %140 : vector<4x32xf32>
    %cst_55 = arith.constant 1.000000e+00 : f32
    %142 = vector.broadcast %cst_55 : f32 to vector<4x32xf32>
    %143 = arith.addf %142, %141 : vector<4x32xf32>
    %144 = arith.divf %142, %143 : vector<4x32xf32>
    %145 = vector.extract_strided_slice %19 {offsets = [16, 0], sizes = [4, 32], strides = [1, 1]} : vector<32x32xf32> to vector<4x32xf32>
    %146 = arith.addf %145, %136 : vector<4x32xf32>
    %147 = arith.negf %146 : vector<4x32xf32>
    %148 = math.exp %147 : vector<4x32xf32>
    %cst_56 = arith.constant 1.000000e+00 : f32
    %149 = vector.broadcast %cst_56 : f32 to vector<4x32xf32>
    %150 = arith.addf %149, %148 : vector<4x32xf32>
    %151 = arith.divf %149, %150 : vector<4x32xf32>
    %152 = vector.extract_strided_slice %24 {offsets = [16, 0], sizes = [4, 32], strides = [1, 1]} : vector<32x32xf32> to vector<4x32xf32>
    %153 = vector.broadcast %9 : vector<1x32xf32> to vector<4x32xf32>
    %154 = arith.addf %137, %153 : vector<4x32xf32>
    %155 = arith.mulf %144, %154 : vector<4x32xf32>
    %156 = arith.addf %152, %155 : vector<4x32xf32>
    %157 = math.tanh %156 : vector<4x32xf32>
    %cst_57 = arith.constant 1.000000e+00 : f32
    %158 = vector.broadcast %cst_57 : f32 to vector<4x32xf32>
    %159 = arith.subf %158, %151 : vector<4x32xf32>
    %160 = arith.mulf %159, %157 : vector<4x32xf32>
    %161 = arith.mulf %151, %134 : vector<4x32xf32>
    %162 = arith.addf %160, %161 : vector<4x32xf32>
    %cst_58 = arith.constant dense<0.000000e+00> : vector<4x32xf32>
    %163 = tpu.matmul %162, %26, %cst_58 {dimension_numbers = #tpu.dot_dimension_numbers<[1], [0], [0], [1], [0, 0, 1, 1], [], []>} : vector<4x32xf32>, vector<32x32xf32>, vector<4x32xf32> -> vector<4x32xf32>
    %cst_59 = arith.constant dense<0.000000e+00> : vector<4x32xf32>
    %164 = tpu.matmul %162, %28, %cst_59 {dimension_numbers = #tpu.dot_dimension_numbers<[1], [0], [0], [1], [0, 0, 1, 1], [], []>} : vector<4x32xf32>, vector<32x32xf32>, vector<4x32xf32> -> vector<4x32xf32>
    %cst_60 = arith.constant dense<0.000000e+00> : vector<4x32xf32>
    %165 = tpu.matmul %162, %30, %cst_60 {dimension_numbers = #tpu.dot_dimension_numbers<[1], [0], [0], [1], [0, 0, 1, 1], [], []>} : vector<4x32xf32>, vector<32x32xf32>, vector<4x32xf32> -> vector<4x32xf32>
    %166 = vector.extract_strided_slice %14 {offsets = [20, 0], sizes = [4, 32], strides = [1, 1]} : vector<32x32xf32> to vector<4x32xf32>
    %167 = arith.addf %166, %163 : vector<4x32xf32>
    %168 = arith.negf %167 : vector<4x32xf32>
    %169 = math.exp %168 : vector<4x32xf32>
    %cst_61 = arith.constant 1.000000e+00 : f32
    %170 = vector.broadcast %cst_61 : f32 to vector<4x32xf32>
    %171 = arith.addf %170, %169 : vector<4x32xf32>
    %172 = arith.divf %170, %171 : vector<4x32xf32>
    %173 = vector.extract_strided_slice %19 {offsets = [20, 0], sizes = [4, 32], strides = [1, 1]} : vector<32x32xf32> to vector<4x32xf32>
    %174 = arith.addf %173, %164 : vector<4x32xf32>
    %175 = arith.negf %174 : vector<4x32xf32>
    %176 = math.exp %175 : vector<4x32xf32>
    %cst_62 = arith.constant 1.000000e+00 : f32
    %177 = vector.broadcast %cst_62 : f32 to vector<4x32xf32>
    %178 = arith.addf %177, %176 : vector<4x32xf32>
    %179 = arith.divf %177, %178 : vector<4x32xf32>
    %180 = vector.extract_strided_slice %24 {offsets = [20, 0], sizes = [4, 32], strides = [1, 1]} : vector<32x32xf32> to vector<4x32xf32>
    %181 = vector.broadcast %9 : vector<1x32xf32> to vector<4x32xf32>
    %182 = arith.addf %165, %181 : vector<4x32xf32>
    %183 = arith.mulf %172, %182 : vector<4x32xf32>
    %184 = arith.addf %180, %183 : vector<4x32xf32>
    %185 = math.tanh %184 : vector<4x32xf32>
    %cst_63 = arith.constant 1.000000e+00 : f32
    %186 = vector.broadcast %cst_63 : f32 to vector<4x32xf32>
    %187 = arith.subf %186, %179 : vector<4x32xf32>
    %188 = arith.mulf %187, %185 : vector<4x32xf32>
    %189 = arith.mulf %179, %162 : vector<4x32xf32>
    %190 = arith.addf %188, %189 : vector<4x32xf32>
    %cst_64 = arith.constant dense<0.000000e+00> : vector<4x32xf32>
    %191 = tpu.matmul %190, %26, %cst_64 {dimension_numbers = #tpu.dot_dimension_numbers<[1], [0], [0], [1], [0, 0, 1, 1], [], []>} : vector<4x32xf32>, vector<32x32xf32>, vector<4x32xf32> -> vector<4x32xf32>
    %cst_65 = arith.constant dense<0.000000e+00> : vector<4x32xf32>
    %192 = tpu.matmul %190, %28, %cst_65 {dimension_numbers = #tpu.dot_dimension_numbers<[1], [0], [0], [1], [0, 0, 1, 1], [], []>} : vector<4x32xf32>, vector<32x32xf32>, vector<4x32xf32> -> vector<4x32xf32>
    %cst_66 = arith.constant dense<0.000000e+00> : vector<4x32xf32>
    %193 = tpu.matmul %190, %30, %cst_66 {dimension_numbers = #tpu.dot_dimension_numbers<[1], [0], [0], [1], [0, 0, 1, 1], [], []>} : vector<4x32xf32>, vector<32x32xf32>, vector<4x32xf32> -> vector<4x32xf32>
    %194 = vector.extract_strided_slice %14 {offsets = [24, 0], sizes = [4, 32], strides = [1, 1]} : vector<32x32xf32> to vector<4x32xf32>
    %195 = arith.addf %194, %191 : vector<4x32xf32>
    %196 = arith.negf %195 : vector<4x32xf32>
    %197 = math.exp %196 : vector<4x32xf32>
    %cst_67 = arith.constant 1.000000e+00 : f32
    %198 = vector.broadcast %cst_67 : f32 to vector<4x32xf32>
    %199 = arith.addf %198, %197 : vector<4x32xf32>
    %200 = arith.divf %198, %199 : vector<4x32xf32>
    %201 = vector.extract_strided_slice %19 {offsets = [24, 0], sizes = [4, 32], strides = [1, 1]} : vector<32x32xf32> to vector<4x32xf32>
    %202 = arith.addf %201, %192 : vector<4x32xf32>
    %203 = arith.negf %202 : vector<4x32xf32>
    %204 = math.exp %203 : vector<4x32xf32>
    %cst_68 = arith.constant 1.000000e+00 : f32
    %205 = vector.broadcast %cst_68 : f32 to vector<4x32xf32>
    %206 = arith.addf %205, %204 : vector<4x32xf32>
    %207 = arith.divf %205, %206 : vector<4x32xf32>
    %208 = vector.extract_strided_slice %24 {offsets = [24, 0], sizes = [4, 32], strides = [1, 1]} : vector<32x32xf32> to vector<4x32xf32>
    %209 = vector.broadcast %9 : vector<1x32xf32> to vector<4x32xf32>
    %210 = arith.addf %193, %209 : vector<4x32xf32>
    %211 = arith.mulf %200, %210 : vector<4x32xf32>
    %212 = arith.addf %208, %211 : vector<4x32xf32>
    %213 = math.tanh %212 : vector<4x32xf32>
    %cst_69 = arith.constant 1.000000e+00 : f32
    %214 = vector.broadcast %cst_69 : f32 to vector<4x32xf32>
    %215 = arith.subf %214, %207 : vector<4x32xf32>
    %216 = arith.mulf %215, %213 : vector<4x32xf32>
    %217 = arith.mulf %207, %190 : vector<4x32xf32>
    %218 = arith.addf %216, %217 : vector<4x32xf32>
    %cst_70 = arith.constant dense<0.000000e+00> : vector<4x32xf32>
    %219 = tpu.matmul %218, %26, %cst_70 {dimension_numbers = #tpu.dot_dimension_numbers<[1], [0], [0], [1], [0, 0, 1, 1], [], []>} : vector<4x32xf32>, vector<32x32xf32>, vector<4x32xf32> -> vector<4x32xf32>
    %cst_71 = arith.constant dense<0.000000e+00> : vector<4x32xf32>
    %220 = tpu.matmul %218, %28, %cst_71 {dimension_numbers = #tpu.dot_dimension_numbers<[1], [0], [0], [1], [0, 0, 1, 1], [], []>} : vector<4x32xf32>, vector<32x32xf32>, vector<4x32xf32> -> vector<4x32xf32>
    %cst_72 = arith.constant dense<0.000000e+00> : vector<4x32xf32>
    %221 = tpu.matmul %218, %30, %cst_72 {dimension_numbers = #tpu.dot_dimension_numbers<[1], [0], [0], [1], [0, 0, 1, 1], [], []>} : vector<4x32xf32>, vector<32x32xf32>, vector<4x32xf32> -> vector<4x32xf32>
    %222 = vector.extract_strided_slice %14 {offsets = [28, 0], sizes = [4, 32], strides = [1, 1]} : vector<32x32xf32> to vector<4x32xf32>
    %223 = arith.addf %222, %219 : vector<4x32xf32>
    %224 = arith.negf %223 : vector<4x32xf32>
    %225 = math.exp %224 : vector<4x32xf32>
    %cst_73 = arith.constant 1.000000e+00 : f32
    %226 = vector.broadcast %cst_73 : f32 to vector<4x32xf32>
    %227 = arith.addf %226, %225 : vector<4x32xf32>
    %228 = arith.divf %226, %227 : vector<4x32xf32>
    %229 = vector.extract_strided_slice %19 {offsets = [28, 0], sizes = [4, 32], strides = [1, 1]} : vector<32x32xf32> to vector<4x32xf32>
    %230 = arith.addf %229, %220 : vector<4x32xf32>
    %231 = arith.negf %230 : vector<4x32xf32>
    %232 = math.exp %231 : vector<4x32xf32>
    %cst_74 = arith.constant 1.000000e+00 : f32
    %233 = vector.broadcast %cst_74 : f32 to vector<4x32xf32>
    %234 = arith.addf %233, %232 : vector<4x32xf32>
    %235 = arith.divf %233, %234 : vector<4x32xf32>
    %236 = vector.extract_strided_slice %24 {offsets = [28, 0], sizes = [4, 32], strides = [1, 1]} : vector<32x32xf32> to vector<4x32xf32>
    %237 = vector.broadcast %9 : vector<1x32xf32> to vector<4x32xf32>
    %238 = arith.addf %221, %237 : vector<4x32xf32>
    %239 = arith.mulf %228, %238 : vector<4x32xf32>
    %240 = arith.addf %236, %239 : vector<4x32xf32>
    %241 = math.tanh %240 : vector<4x32xf32>
    %cst_75 = arith.constant 1.000000e+00 : f32
    %242 = vector.broadcast %cst_75 : f32 to vector<4x32xf32>
    %243 = arith.subf %242, %235 : vector<4x32xf32>
    %244 = arith.mulf %243, %241 : vector<4x32xf32>
    %245 = arith.mulf %235, %218 : vector<4x32xf32>
    %246 = arith.addf %244, %245 : vector<4x32xf32>
    %247 = tpu.concatenate %50, %78, %106, %134, %162, %190, %218, %246 in 0 : vector<4x32xf32>, vector<4x32xf32>, vector<4x32xf32>, vector<4x32xf32>, vector<4x32xf32>, vector<4x32xf32>, vector<4x32xf32>, vector<4x32xf32> -> vector<32x32xf32>
    %c0_76 = arith.constant 0 : index
    %c0_77 = arith.constant 0 : index
    %248 = vector.load %arg4[%c0_76, %c0_77] : memref<32x2xf32, #tpu.memory_space<vmem>>, vector<32x2xf32>
    %cst_78 = arith.constant dense<0.000000e+00> : vector<32x2xf32>
    %249 = tpu.matmul %247, %248, %cst_78 {dimension_numbers = #tpu.dot_dimension_numbers<[1], [0], [0], [1], [0, 0, 1, 1], [], []>} : vector<32x32xf32>, vector<32x2xf32>, vector<32x2xf32> -> vector<32x2xf32>
    %c0_79 = arith.constant 0 : index
    %c0_80 = arith.constant 0 : index
    %250 = vector.load %arg5[%c0_79, %c0_80] : memref<1x2xf32, #tpu.memory_space<vmem>>, vector<1x2xf32>
    %251 = vector.broadcast %250 : vector<1x2xf32> to vector<32x2xf32>
    %252 = arith.addf %249, %251 : vector<32x2xf32>
    %253 = vector.shape_cast %252 : vector<32x2xf32> to vector<8x4x2xf32>
    %c0_81 = arith.constant 0 : index
    %c0_82 = arith.constant 0 : index
    %c0_83 = arith.constant 0 : index
    %254 = vector.load %arg6[%c0_81, %c0_82, %c0_83] : memref<8x4x2xf32, #tpu.memory_space<vmem>>, vector<8x4x2xf32>
    tpu.vector_store %arg6[%c0_81, %c0_82, %c0_83], %253 {strides = array<i32>} : memref<8x4x2xf32, #tpu.memory_space<vmem>>, vector<8x4x2xf32>,
    return
  }
}

</mosaic_0001>

<bundles_post_ra>
// kernel: encoder_forward.1
= control target key start
LH: loop header
LB: loop body
LE: loop exit
PB: predicated region body
PF: predicated region fallthrough
CT: control target
= control target key end

     0   :  { %vm66_vm0 = vcmask 1043456   ;;  %vm57_vm1 = vcmask 31744   ;;  %v2902_v12 = vmov 0.0|0.0   ;;  %vm2903_vm2 = vmmov 0   ;;  %s3331_s1 = inlined_call_operand.vmem [shape: f32[3,4,32], index: 1, kind: input, shape index: {}]   ;;  %s3332_s0 = inlined_call_operand.vmem [shape: f32[8,4,4], index: 0, kind: input, shape index: {}]   ;;  %s3333_s2 = inlined_call_operand.vmem [shape: f32[3,32,32], index: 2, kind: input, shape index: {}]   ;;  %s3334_s3 = inlined_call_operand.vmem [shape: f32[4,1,32], index: 3, kind: input, shape index: {}]   ;;  %s3335_s4 = inlined_call_operand.vmem [shape: f32[32,2], index: 4, kind: input, shape index: {}]   ;;  %s3336_s5 = inlined_call_operand.vmem [shape: f32[1,2], index: 5, kind: input, shape index: {}]   ;;  %s3337_s6 = inlined_call_operand.vmem [shape: f32[8,4,2], index: 6, kind: output, shape index: {}]  }
   0x1   :  { %v38_v0 = vld [vmem:[%s3331_s1] sm:$0xf]  ;;  %v2819_v2 = vld [vmem:[%s3332_s0 + $0x8] sm:$0xff]   ;;  %v2219_v3 = vld [vmem:[%s3331_s1 + $0x4] sm:$0xf]  ;;  %v2904_v20 = vmov 0.0  }
   0x2   :  { %2412 = vmatprep.subr.msk.mxu1 %vm66_vm0, %v38_v0  ;;  %v2818_v1 = vld [vmem:[%s3332_s0] sm:$0xff]   ;;  %v2820_v4 = vld [vmem:[%s3332_s0 + $0x10] sm:$0xff]   ;;  %v2821_v5 = vld [vmem:[%s3332_s0 + $0x18] sm:$0xff]   ;;  %vm384_vm3 = vcmask 261120   ;;  %vm2197_vm4 = vcmask 11264  }
   0x3   :  { %2413 = vmatpush3.msk.msra.mxu1 %vm66_vm0, %v38_v0  ;;  %2414 = vmatprep.mubr.msk.f32.mxu1 %vm57_vm1, %v2818_v1  ;;  %v2226_v6 = vld [vmem:[%s3331_s1 + $0x8] sm:$0xf]  ;;  %v347_v7 = vld [vmem:[%s3333_s2] sm:$0xff]  ;;  %v349_v14 = vld [vmem:[%s3333_s2 + $0x10] sm:$0xff] }
   0x4   :  { %2420 = vmatprep.subr.msk.mxu1 %vm66_vm0, %v2219_v3  ;;  %2415 = vmatmul.mubr.msk.f32.vlgmr.msra.gmra.mrb[0].mxu1 %vm57_vm1, %v2819_v2  ;;  %v348_v8 = vld [vmem:[%s3333_s2 + $0x8] sm:$0xff]  ;;  %v2233_v10 = vld [vmem:[%s3333_s2 + $0x20] sm:$0xff]  ;;  %v350_v15 = vld [vmem:[%s3333_s2 + $0x18] sm:$0xff] }
   0x5   :  { %2430 = vmatprep.mubr.msk.f32.mxu0 %vm57_vm1, %v2818_v1  ;;  %2421 = vmatpush3.msk.msra.mxu1 %vm66_vm0, %v2219_v3  ;;  %v2985_v9 = vpack.c.bf16 %v348_v8, %v347_v7  ;;  %v2234_v11 = vld [vmem:[%s3333_s2 + $0x28] sm:$0xff]  ;;  %v3006_v16 = vpack.c.bf16 %v350_v15, %v349_v14  ;;  %v2235_v17 = vld [vmem:[%s3333_s2 + $0x30] sm:$0xff]  ;;  %v2236_v18 = vld [vmem:[%s3333_s2 + $0x38] sm:$0xff] }
   0x6   :  { %2417 = vmatprep.mubr.msk.f32.mxu1 %vm57_vm1, %v2820_v4  ;;  %2428 = vmatprep.subr.msk.mxu0 %vm66_vm0, %v2226_v6  ;;  %v2995_v13 = vpack.c.bf16 %v2234_v11, %v2233_v10  ;;  %v3015_v19 = vpack.c.bf16 %v2236_v18, %v2235_v17  ;;  %v2213_v21 = vld [vmem:[%s3334_s3] ss:$0 sm:$0xff]  ;;  %v2227_v26 = vld [vmem:[%s3334_s3 + $0x2] ss:$0 sm:$0xff]  ;;  %v2220_v35 = vld [vmem:[%s3334_s3 + $0x1] ss:$0 sm:$0xff] }
   0x7   :  { %2429 = vmatpush3.msk.msra.mxu0 %vm66_vm0, %v2226_v6  ;;  %2681 = vmatprep.subr.bf16.mxu1 %v2902_v12  ;;  %v3058_v53 = vld [vmem:[%s3334_s3 + $0x3] ss:$0 sm:$0xff]  ;;  %v2238_v61 = vld [vmem:[%s3333_s2 + $0x48] sm:$0xff] }
   0x8   :  { %2418 = vmatmul.mubr.msk.f32.gmra.mrb[2].mxu1 %vm57_vm1, %v2821_v5  ;;  %2431 = vmatmul.mubr.msk.f32.vlgmr.msra.gmra.mrb[0].mxu0 %vm57_vm1, %v2819_v2  ;;  %v2237_v60 = vld [vmem:[%s3333_s2 + $0x40] sm:$0xff] }
   0x9   :  { %2422 = vmatprep.mubr.msk.f32.mxu1 %vm57_vm1, %v2818_v1  ;;  %2433 = vmatprep.mubr.msk.f32.mxu0 %vm57_vm1, %v2820_v4  ;;  %v3067_v63 = vpack.c.bf16 %v2238_v61, %v2237_v60  ;;  %v2239_v1 = vld [vmem:[%s3333_s2 + $0x50] sm:$0xff] }
   0xa   :  { %2687 = vmatprep.subr.bf16.mxu0 %v2902_v12 }
   0xb   :  { %2689 = vmatpush3.bf16.msra.mxu0 %v2995_v13 }
   0xc   :  { %2423 = vmatmul.mubr.msk.f32.vlgmr.msra.gmra.mrb[4].mxu1 %vm57_vm1, %v2819_v2  ;;  %2434 = vmatmul.mubr.msk.f32.gmra.mrb[2].mxu0 %vm57_vm1, %v2821_v5  ;;  %v2240_v2 = vld [vmem:[%s3333_s2 + $0x58] sm:$0xff] }
   0xd   :  { %2425 = vmatprep.mubr.msk.f32.mxu1 %vm57_vm1, %v2820_v4  ;;  %2683 = vmatpush3.bf16.msra.mxu1 %v2985_v9  ;;  %v3082_v3 = vpack.c.bf16 %v2240_v2, %v2239_v1 }
   0xe   :  { %2684 = vmatprep.subr.bf16.mxu1 %v2902_v12  ;;  %2690 = vmatprep.subr.bf16.mxu0 %v2902_v12 }
   0xf   :  { %2692 = vmatpush3.bf16.msra.mxu0 %v3015_v19  ;;  %2455 = vmatprep.mubr.msk.f32.mxu0 %vm2903_vm2, %v2904_v20 }
  0x10   :  { %2426 = vmatmul.mubr.msk.f32.gmra.mrb[6].mxu1 %vm57_vm1, %v2821_v5  ;;  %2699 = vmatprep.subr.bf16.mxu0 %v2902_v12 }
  0x11   :  { %2686 = vmatpush3.bf16.msra.mxu1 %v3006_v16  ;;  %2444 = vmatprep.mubr.msk.f32.mxu1 %vm2903_vm2, %v2904_v20 }
  0x12   :  { %2693 = vmatprep.subr.bf16.mxu1 %v2902_v12 }
  0xd7   :  { %v2416_v22 = vpop.f32.mrb[0].mxu1 }
  0xd8   :  { %v3028_v23 = vadd.f32 %v2416_v22, %v2213_v21  ;;  %v136_v24 = vpop.f32.mrb[1].mxu1 }
  0xd9   :  { %v3030_v25 = vadd.f32 %v2213_v21, %v136_v24 }
  0xdb   :  { %v2241_v27 = vmul.f32 -1.442695, %v3030_v25  ;;  %v2419_v28 = vpop.f32.mrb[2].mxu1  ;;  %v2432_v29 = vpop.f32.mrb[0].mxu0 }
  0xdc   :  { %v3036_v30 = vadd.f32 %v2419_v28, %v2213_v21  ;;  %v146_v31 = vpop.f32.mrb[3].mxu1  ;;  %v3038_v32 = vadd.f32 %v2432_v29, %v2227_v26  ;;  %v328_v33 = vpop.f32.mrb[1].mxu0 }
  0xdd   :  { %2822 = vpow2.f32 %v2241_v27  ;;  %v3040_v34 = vadd.f32 %v2213_v21, %v146_v31  ;;  %v329_v54 = vadd.f32 %v2227_v26, %v328_v33 }
  0xdf   :  { %v2424_v36 = vpop.f32.mrb[4].mxu1  ;;  %v2435_v37 = vpop.f32.mrb[2].mxu0 }
  0xe0   :  { %v3045_v38 = vadd.f32 %v2424_v36, %v2220_v35  ;;  %v232_v39 = vpop.f32.mrb[5].mxu1  ;;  %v3047_v40 = vadd.f32 %v2435_v37, %v2227_v26  ;;  %v338_v41 = vpop.f32.mrb[3].mxu0 }
  0xe1   :  { %v233_v42 = vadd.f32 %v2220_v35, %v232_v39  ;;  %v3049_v43 = vadd.f32 %v2227_v26, %v338_v41 }
  0xe3   :  { %v2242_v44 = vmul.f32 -1.442695, %v233_v42  ;;  %v2427_v45 = vpop.f32.mrb[6].mxu1 }
  0xe4   :  { %v3051_v46 = vadd.f32 %v2427_v45, %v2220_v35  ;;  %v242_v47 = vpop.f32.mrb[7].mxu1 }
  0xe5   :  { %2824 = vpow2.f32 %v2242_v44  ;;  %v3053_v48 = vadd.f32 %v2220_v35, %v242_v47 }
  0xe7   :  { %v2823_v49 = vpop.eup %2822 }
  0xe8   :  { %v364_v50 = vadd.f32 1.0, %v2823_v49 }
  0xea   :  { %2826 = vrcp.f32 %v364_v50 }
  0xef   :  { %v2825_v51 = vpop.eup %2824 }
  0xf0   :  { %v370_v52 = vadd.f32 1.0, %v2825_v51 }
  0xf2   :  { %2828 = vrcp.f32 %v370_v52 }
  0xf4   :  { %v2827_v55 = vpop.eup %2826 }
  0xf5   :  { %v379_v56 = vmul.f32 %v2827_v55, %v3058_v53 }
  0xf7   :  { %v380_v57 = vadd.f32 %v379_v56, %v329_v54 }
  0xf9   :  { %2830 = vtanh.f32 %v380_v57 }
  0xfc   :  { %v2829_v58 = vpop.eup %2828 }
  0xfd   :  { %v382_v59 = vsub.f32 1.0, %v2829_v58 }
 0x103   :  { %v2831_v62 = vpop.eup %2830 }
 0x104   :  { %v3069_v0 = vmul.f32 %v2831_v62, %v382_v59 }
 0x106   :  { %2445 = vmatmul.mubr.msk.f32.vlgmr.msra.gmra.mrb[8].mxu1 %vm384_vm3, %v3069_v0  ;;  %2456 = vmatmul.mubr.msk.f32.vlgmr.msra.gmra.mrb[4].mxu0 %vm384_vm3, %v3069_v0  ;;  %v626_v37 = vrot.slane %v3069_v0, 4 }
 0x107   :  { %2695 = vmatpush3.bf16.msra.mxu1 %v3067_v63  ;;  %2466 = vmatprep.mubr.msk.f32.mxu1 %vm2903_vm2, %v2904_v20 }
 0x108   :  { %2696 = vmatprep.subr.bf16.mxu1 %v2902_v12  ;;  %2701 = vmatpush3.bf16.msra.mxu0 %v2985_v9 }
 0x109   :  { %2702 = vmatprep.subr.bf16.mxu0 %v2902_v12  ;;  %2477 = vmatprep.mubr.msk.f32.mxu0 %vm2903_vm2, %v2904_v20 }
 0x10b   :  { %2698 = vmatpush3.bf16.msra.mxu1 %v3082_v3 }
 0x10c   :  { %2705 = vmatprep.subr.bf16.mxu1 %v2902_v12  ;;  %2704 = vmatpush3.bf16.msra.mxu0 %v3006_v16 }
 0x10d   :  { %2711 = vmatprep.subr.bf16.mxu0 %v2902_v12 }
 0x10e   :  { %2467 = vmatmul.mubr.msk.f32.vlgmr.msra.gmra.mrb[10].mxu1 %vm384_vm3, %v3069_v0 }
 0x10f   :  { %2707 = vmatpush3.bf16.msra.mxu1 %v2995_v13  ;;  %2488 = vmatprep.mubr.msk.f32.mxu1 %vm2903_vm2, %v2904_v20 }
 0x110   :  { %2708 = vmatprep.subr.bf16.mxu1 %v2902_v12 }
 0x113   :  { %2710 = vmatpush3.bf16.msra.mxu1 %v3015_v19 }
 0x114   :  { %2717 = vmatprep.subr.bf16.mxu1 %v2902_v12 }
 0x1d9   :  { %v454_v4 = vpop.f32.mrb[8].mxu1  ;;  %v524_v5 = vpop.f32.mrb[4].mxu0 }
 0x1da   :  { %v529_v6 = vrot.slane %v454_v4, 4  ;;  %v2446_v7 = vpop.f32.mrb[9].mxu1  ;;  %v2457_v8 = vpop.f32.mrb[5].mxu0  ;;  %v539_v10 = vrot.slane %v524_v5, 4 }
 0x1dc   :  { %v531_v11 = vadd.f32 %v529_v6, %v3030_v25  ;;  %v541_v15 = vadd.f32 %v539_v10, %v233_v42 }
 0x1de   :  { %v2246_v14 = vmul.f32 -1.442695, %v531_v11  ;;  %v2247_v21 = vmul.f32 -1.442695, %v541_v15 }
 0x1e0   :  { %2832 = vpow2.f32 %v2246_v14 }
 0x1e1   :  { %v614_v17 = vpop.f32.mrb[10].mxu1  ;;  %2834 = vpow2.f32 %v2247_v21 }
 0x1e2   :  { %v2468_v18 = vpop.f32.mrb[11].mxu1  ;;  %v615_v27 = vadd.f32 %v3058_v53, %v614_v17 }
 0x1e4   :  { %v619_v29 = vrot.slane %v615_v27, 4 }
 0x1ea   :  { %v2833_v22 = vpop.eup %2832 }
 0x1eb   :  { %v535_v24 = vadd.f32 1.0, %v2833_v22  ;;  %v2835_v26 = vpop.eup %2834 }
 0x1ec   :  { %v545_v28 = vadd.f32 1.0, %v2835_v26 }
 0x1ed   :  { %2836 = vrcp.f32 %v535_v24 }
 0x1ee   :  { %2838 = vrcp.f32 %v545_v28 }
 0x1f7   :  { %v2837_v31 = vpop.eup %2836 }
 0x1f8   :  { %v621_v33 = vmul.f32 %v2837_v31, %v619_v29  ;;  %v2839_v25 = vpop.eup %2838 }
 0x1f9   :  { %v624_v36 = vsub.f32 1.0, %v2839_v25  ;;  %v628_v42 = vmul.f32 %v2839_v25, %v626_v37 }
 0x1fa   :  { %v622_v35 = vadd.f32 %v621_v33, %v329_v54 }
 0x1fc   :  { %2840 = vtanh.f32 %v622_v35 }
 0x206   :  { %v2841_v39 = vpop.eup %2840 }
 0x207   :  { %v625_v41 = vmul.f32 %v2841_v39, %v624_v36 }
 0x209   :  { %v3106_v44 = vadd.f32 %v628_v42, %v625_v41 }
 0x20b   :  { %v631_v45 = vrot.slane %v3106_v44, 4 }
 0x20d   :  { %2478 = vmatmul.mubr.msk.f32.vlgmr.msra.gmra.mrb[6].mxu0 %vm384_vm3, %v631_v45  ;;  %2489 = vmatmul.mubr.msk.f32.vlgmr.msra.gmra.mrb[12].mxu1 %vm384_vm3, %v631_v45 }
 0x20e   :  { %2713 = vmatpush3.bf16.msra.mxu0 %v3067_v63  ;;  %2499 = vmatprep.mubr.msk.f32.mxu0 %vm2903_vm2, %v2904_v20 }
 0x20f   :  { %2714 = vmatprep.subr.bf16.mxu0 %v2902_v12  ;;  %2719 = vmatpush3.bf16.msra.mxu1 %v2985_v9 }
 0x210   :  { %2720 = vmatprep.subr.bf16.mxu1 %v2902_v12  ;;  %2510 = vmatprep.mubr.msk.f32.mxu1 %vm2903_vm2, %v2904_v20 }
 0x212   :  { %2716 = vmatpush3.bf16.msra.mxu0 %v3082_v3 }
 0x213   :  { %2723 = vmatprep.subr.bf16.mxu0 %v2902_v12  ;;  %2722 = vmatpush3.bf16.msra.mxu1 %v3006_v16 }
 0x214   :  { %2729 = vmatprep.subr.bf16.mxu1 %v2902_v12 }
 0x215   :  { %2500 = vmatmul.mubr.msk.f32.vlgmr.msra.gmra.mrb[8].mxu0 %vm384_vm3, %v631_v45 }
 0x216   :  { %2725 = vmatpush3.bf16.msra.mxu0 %v2995_v13  ;;  %2521 = vmatprep.mubr.msk.f32.mxu0 %vm2903_vm2, %v2904_v20 }
 0x217   :  { %2726 = vmatprep.subr.bf16.mxu0 %v2902_v12 }
 0x21a   :  { %2728 = vmatpush3.bf16.msra.mxu0 %v3015_v19 }
 0x21b   :  { %2735 = vmatprep.subr.bf16.mxu0 %v2902_v12 }
 0x2e0   :  { %v700_v47 = vpop.f32.mrb[6].mxu0  ;;  %v770_v49 = vpop.f32.mrb[12].mxu1 }
 0x2e1   :  { %v774_v50 = vadd.f32 %v700_v47, %v3028_v23  ;;  %v2479_v51 = vpop.f32.mrb[7].mxu0  ;;  %v2490_v52 = vpop.f32.mrb[13].mxu1  ;;  %v781_v55 = vadd.f32 %v770_v49, %v3045_v38 }
 0x2e3   :  { %v2251_v54 = vmul.f32 -1.442695, %v774_v50  ;;  %v2252_v56 = vmul.f32 -1.442695, %v781_v55 }
 0x2e5   :  { %2842 = vpow2.f32 %v2251_v54 }
 0x2e6   :  { %2844 = vpow2.f32 %v2252_v56 }
 0x2e8   :  { %v854_v57 = vpop.f32.mrb[8].mxu0 }
 0x2e9   :  { %v2501_v58 = vpop.f32.mrb[9].mxu0  ;;  %v855_v1 = vadd.f32 %v3058_v53, %v854_v57 }
 0x2ef   :  { %v2843_v59 = vpop.eup %2842 }
 0x2f0   :  { %v778_v60 = vadd.f32 1.0, %v2843_v59  ;;  %v2845_v61 = vpop.eup %2844 }
 0x2f1   :  { %v785_v62 = vadd.f32 1.0, %v2845_v61 }
 0x2f2   :  { %2846 = vrcp.f32 %v778_v60 }
 0x2f3   :  { %2848 = vrcp.f32 %v785_v62 }
 0x2fc   :  { %v2847_v2 = vpop.eup %2846 }
 0x2fd   :  { %v858_v4 = vmul.f32 %v2847_v2, %v855_v1  ;;  %v2849_v6 = vpop.eup %2848 }
 0x2fe   :  { %v861_v7 = vsub.f32 1.0, %v2849_v6  ;;  %v864_v11 = vmul.f32 %v2849_v6, %v631_v45 }
 0x2ff   :  { %v859_v5 = vadd.f32 %v858_v4, %v3038_v32 }
 0x301   :  { %2850 = vtanh.f32 %v859_v5 }
 0x30b   :  { %v2851_v8 = vpop.eup %2850 }
 0x30c   :  { %v862_v10 = vmul.f32 %v2851_v8, %v861_v7 }
 0x30e   :  { %v3134_v14 = vadd.f32 %v864_v11, %v862_v10 }
 0x310   :  { %2511 = vmatmul.mubr.msk.f32.vlgmr.msra.gmra.mrb[14].mxu1 %vm384_vm3, %v3134_v14  ;;  %2522 = vmatmul.mubr.msk.f32.vlgmr.msra.gmra.mrb[10].mxu0 %vm384_vm3, %v3134_v14  ;;  %v1107_v49 = vrot.slane %v3134_v14, 4 }
 0x311   :  { %2731 = vmatpush3.bf16.msra.mxu1 %v3067_v63  ;;  %2532 = vmatprep.mubr.msk.f32.mxu1 %vm2903_vm2, %v2904_v20 }
 0x312   :  { %2732 = vmatprep.subr.bf16.mxu1 %v2902_v12  ;;  %2737 = vmatpush3.bf16.msra.mxu0 %v2985_v9 }
 0x313   :  { %2738 = vmatprep.subr.bf16.mxu0 %v2902_v12  ;;  %2543 = vmatprep.mubr.msk.f32.mxu0 %vm2903_vm2, %v2904_v20 }
 0x315   :  { %2734 = vmatpush3.bf16.msra.mxu1 %v3082_v3 }
 0x316   :  { %2741 = vmatprep.subr.bf16.mxu1 %v2902_v12  ;;  %2740 = vmatpush3.bf16.msra.mxu0 %v3006_v16 }
 0x317   :  { %2747 = vmatprep.subr.bf16.mxu0 %v2902_v12 }
 0x318   :  { %2533 = vmatmul.mubr.msk.f32.vlgmr.msra.gmra.mrb[16].mxu1 %vm384_vm3, %v3134_v14 }
 0x319   :  { %2743 = vmatpush3.bf16.msra.mxu1 %v2995_v13  ;;  %2554 = vmatprep.mubr.msk.f32.mxu1 %vm2903_vm2, %v2904_v20 }
 0x31a   :  { %2744 = vmatprep.subr.bf16.mxu1 %v2902_v12 }
 0x31d   :  { %2746 = vmatpush3.bf16.msra.mxu1 %v3015_v19 }
 0x31e   :  { %2753 = vmatprep.subr.bf16.mxu1 %v2902_v12 }
 0x3e3   :  { %v935_v15 = vpop.f32.mrb[14].mxu1  ;;  %v1005_v17 = vpop.f32.mrb[10].mxu0 }
 0x3e4   :  { %v1010_v18 = vrot.slane %v935_v15, 4  ;;  %v2512_v21 = vpop.f32.mrb[15].mxu1  ;;  %v2523_v22 = vpop.f32.mrb[11].mxu0  ;;  %v1020_v24 = vrot.slane %v1005_v17, 4 }
 0x3e6   :  { %v1012_v26 = vadd.f32 %v1010_v18, %v3028_v23  ;;  %v1022_v28 = vadd.f32 %v1020_v24, %v3045_v38 }
 0x3e8   :  { %v2256_v27 = vmul.f32 -1.442695, %v1012_v26  ;;  %v2257_v33 = vmul.f32 -1.442695, %v1022_v28 }
 0x3ea   :  { %2852 = vpow2.f32 %v2256_v27 }
 0x3eb   :  { %v1095_v29 = vpop.f32.mrb[16].mxu1  ;;  %2854 = vpow2.f32 %v2257_v33 }
 0x3ec   :  { %v2534_v31 = vpop.f32.mrb[17].mxu1  ;;  %v1096_v37 = vadd.f32 %v3058_v53, %v1095_v29 }
 0x3ee   :  { %v1100_v41 = vrot.slane %v1096_v37, 4 }
 0x3f4   :  { %v2853_v35 = vpop.eup %2852 }
 0x3f5   :  { %v1016_v25 = vadd.f32 1.0, %v2853_v35  ;;  %v2855_v36 = vpop.eup %2854 }
 0x3f6   :  { %v1026_v39 = vadd.f32 1.0, %v2855_v36 }
 0x3f7   :  { %2856 = vrcp.f32 %v1016_v25 }
 0x3f8   :  { %2858 = vrcp.f32 %v1026_v39 }
 0x401   :  { %v2857_v42 = vpop.eup %2856 }
 0x402   :  { %v1102_v45 = vmul.f32 %v2857_v42, %v1100_v41  ;;  %v2859_v38 = vpop.eup %2858 }
 0x403   :  { %v1105_v47 = vsub.f32 1.0, %v2859_v38  ;;  %v1109_v52 = vmul.f32 %v2859_v38, %v1107_v49 }
 0x404   :  { %v1103_v23 = vadd.f32 %v1102_v45, %v3038_v32 }
 0x406   :  { %2860 = vtanh.f32 %v1103_v23 }
 0x410   :  { %v2861_v50 = vpop.eup %2860 }
 0x411   :  { %v1106_v51 = vmul.f32 %v2861_v50, %v1105_v47 }
 0x413   :  { %v3165_v54 = vadd.f32 %v1109_v52, %v1106_v51 }
 0x415   :  { %v1112_v55 = vrot.slane %v3165_v54, 4 }
 0x417   :  { %2544 = vmatmul.mubr.msk.f32.vlgmr.msra.gmra.mrb[12].mxu0 %vm384_vm3, %v1112_v55  ;;  %2555 = vmatmul.mubr.msk.f32.vlgmr.msra.gmra.mrb[18].mxu1 %vm384_vm3, %v1112_v55 }
 0x418   :  { %2749 = vmatpush3.bf16.msra.mxu0 %v3067_v63  ;;  %2565 = vmatprep.mubr.msk.f32.mxu0 %vm2903_vm2, %v2904_v20 }
 0x419   :  { %2750 = vmatprep.subr.bf16.mxu0 %v2902_v12  ;;  %2755 = vmatpush3.bf16.msra.mxu1 %v2985_v9 }
 0x41a   :  { %2756 = vmatprep.subr.bf16.mxu1 %v2902_v12  ;;  %2576 = vmatprep.mubr.msk.f32.mxu1 %vm2903_vm2, %v2904_v20 }
 0x41c   :  { %2752 = vmatpush3.bf16.msra.mxu0 %v3082_v3 }
 0x41d   :  { %2759 = vmatprep.subr.bf16.mxu0 %v2902_v12  ;;  %2758 = vmatpush3.bf16.msra.mxu1 %v3006_v16 }
 0x41e   :  { %2765 = vmatprep.subr.bf16.mxu1 %v2902_v12 }
 0x41f   :  { %2566 = vmatmul.mubr.msk.f32.vlgmr.msra.gmra.mrb[14].mxu0 %vm384_vm3, %v1112_v55 }
 0x420   :  { %2761 = vmatpush3.bf16.msra.mxu0 %v2995_v13  ;;  %2587 = vmatprep.mubr.msk.f32.mxu0 %vm2903_vm2, %v2904_v20 }
 0x421   :  { %2762 = vmatprep.subr.bf16.mxu0 %v2902_v12 }
 0x424   :  { %2764 = vmatpush3.bf16.msra.mxu0 %v3015_v19 }
 0x425   :  { %2771 = vmatprep.subr.bf16.mxu0 %v2902_v12 }
 0x4ea   :  { %v1181_v32 = vpop.f32.mrb[12].mxu0  ;;  %v1251_v56 = vpop.f32.mrb[18].mxu1 }
 0x4eb   :  { %v1255_v57 = vadd.f32 %v1181_v32, %v3040_v34  ;;  %v2545_v58 = vpop.f32.mrb[13].mxu0  ;;  %v2556_v59 = vpop.f32.mrb[19].mxu1  ;;  %v1262_v61 = vadd.f32 %v1251_v56, %v3053_v48 }
 0x4ed   :  { %v2261_v60 = vmul.f32 -1.442695, %v1255_v57  ;;  %v2262_v62 = vmul.f32 -1.442695, %v1262_v61 }
 0x4ef   :  { %2862 = vpow2.f32 %v2261_v60 }
 0x4f0   :  { %2864 = vpow2.f32 %v2262_v62 }
 0x4f2   :  { %v1335_v1 = vpop.f32.mrb[14].mxu0 }
 0x4f3   :  { %v2567_v2 = vpop.f32.mrb[15].mxu0  ;;  %v1336_v8 = vadd.f32 %v3058_v53, %v1335_v1 }
 0x4f9   :  { %v2863_v4 = vpop.eup %2862 }
 0x4fa   :  { %v1259_v5 = vadd.f32 1.0, %v2863_v4  ;;  %v2865_v6 = vpop.eup %2864 }
 0x4fb   :  { %v1266_v7 = vadd.f32 1.0, %v2865_v6 }
 0x4fc   :  { %2866 = vrcp.f32 %v1259_v5 }
 0x4fd   :  { %2868 = vrcp.f32 %v1266_v7 }
 0x506   :  { %v2867_v10 = vpop.eup %2866 }
 0x507   :  { %v1339_v11 = vmul.f32 %v2867_v10, %v1336_v8  ;;  %v2869_v17 = vpop.eup %2868 }
 0x508   :  { %v1342_v18 = vsub.f32 1.0, %v2869_v17  ;;  %v1345_v24 = vmul.f32 %v2869_v17, %v1112_v55 }
 0x509   :  { %v1340_v15 = vadd.f32 %v1339_v11, %v3049_v43 }
 0x50b   :  { %2870 = vtanh.f32 %v1340_v15 }
 0x515   :  { %v2871_v21 = vpop.eup %2870 }
 0x516   :  { %v1343_v22 = vmul.f32 %v2871_v21, %v1342_v18 }
 0x518   :  { %v3193_v26 = vadd.f32 %v1345_v24, %v1343_v22 }
 0x51a   :  { %2577 = vmatmul.mubr.msk.f32.vlgmr.msra.gmra.mrb[20].mxu1 %vm384_vm3, %v3193_v26  ;;  %2588 = vmatmul.mubr.msk.f32.vlgmr.msra.gmra.mrb[16].mxu0 %vm384_vm3, %v3193_v26  ;;  %v1588_v32 = vrot.slane %v3193_v26, 4 }
 0x51b   :  { %2767 = vmatpush3.bf16.msra.mxu1 %v3067_v63  ;;  %2598 = vmatprep.mubr.msk.f32.mxu1 %vm2903_vm2, %v2904_v20 }
 0x51c   :  { %2768 = vmatprep.subr.bf16.mxu1 %v2902_v12  ;;  %2773 = vmatpush3.bf16.msra.mxu0 %v2985_v9 }
 0x51d   :  { %2774 = vmatprep.subr.bf16.mxu0 %v2902_v12  ;;  %2609 = vmatprep.mubr.msk.f32.mxu0 %vm2903_vm2, %v2904_v20 }
 0x51f   :  { %2770 = vmatpush3.bf16.msra.mxu1 %v3082_v3 }
 0x520   :  { %2777 = vmatprep.subr.bf16.mxu1 %v2902_v12  ;;  %2776 = vmatpush3.bf16.msra.mxu0 %v3006_v16 }
 0x521   :  { %2783 = vmatprep.subr.bf16.mxu0 %v2902_v12 }
 0x522   :  { %2599 = vmatmul.mubr.msk.f32.vlgmr.msra.gmra.mrb[22].mxu1 %vm384_vm3, %v3193_v26 }
 0x523   :  { %2779 = vmatpush3.bf16.msra.mxu1 %v2995_v13  ;;  %2620 = vmatprep.mubr.msk.f32.mxu1 %vm2903_vm2, %v2904_v20 }
 0x524   :  { %2780 = vmatprep.subr.bf16.mxu1 %v2902_v12 }
 0x527   :  { %2782 = vmatpush3.bf16.msra.mxu1 %v3015_v19 }
 0x528   :  { %2789 = vmatprep.subr.bf16.mxu1 %v2902_v12 }
 0x5ed   :  { %v1416_v27 = vpop.f32.mrb[20].mxu1  ;;  %v1486_v28 = vpop.f32.mrb[16].mxu0 }
 0x5ee   :  { %v1491_v29 = vrot.slane %v1416_v27, 4  ;;  %v2578_v31 = vpop.f32.mrb[21].mxu1  ;;  %v2589_v33 = vpop.f32.mrb[17].mxu0  ;;  %v1501_v35 = vrot.slane %v1486_v28, 4 }
 0x5ef   :  { %v2079_v33 = vld [vmem:[%s3335_s4 + $0x10] sm:$0xff] }
 0x5f0   :  { %v1493_v25 = vadd.f32 %v1491_v29, %v3040_v34  ;;  %v1503_v37 = vadd.f32 %v1501_v35, %v3053_v48  ;;  %v2080_v35 = vld [vmem:[%s3335_s4 + $0x18] sm:$0xff] }
 0x5f2   :  { %v2266_v36 = vmul.f32 -1.442695, %v1493_v25  ;;  %v2267_v42 = vmul.f32 -1.442695, %v1503_v37  ;;  %v2073_v37 = vsel %vm66_vm0, %v3069_v0, %v3106_v44 }
 0x5f4   :  { %2872 = vpow2.f32 %v2266_v36  ;;  %v2811_v36 = vpack.c.bf16 %v2080_v35, %v2079_v33 }
 0x5f5   :  { %v1576_v39 = vpop.f32.mrb[22].mxu1  ;;  %2874 = vpow2.f32 %v2267_v42 }
 0x5f6   :  { %v2600_v41 = vpop.f32.mrb[23].mxu1  ;;  %v1577_v47 = vadd.f32 %v3058_v53, %v1576_v39 }
 0x5f8   :  { %v1581_v50 = vrot.slane %v1577_v47, 4 }
 0x5fe   :  { %v2873_v45 = vpop.eup %2872 }
 0x5ff   :  { %v1497_v23 = vadd.f32 1.0, %v2873_v45  ;;  %v2875_v38 = vpop.eup %2874  ;;  %v2279_v45 = vld [vmem:[%s3336_s5] ss:$0 sm:$0xff] }
 0x600   :  { %v1507_v49 = vadd.f32 1.0, %v2875_v38 }
 0x601   :  { %2876 = vrcp.f32 %v1497_v23 }
 0x602   :  { %2878 = vrcp.f32 %v1507_v49 }
 0x60b   :  { %v2877_v51 = vpop.eup %2876 }
 0x60c   :  { %v1583_v52 = vmul.f32 %v2877_v51, %v1581_v50  ;;  %v2879_v48 = vpop.eup %2878 }
 0x60d   :  { %v1586_v55 = vsub.f32 1.0, %v2879_v48  ;;  %v1590_v58 = vmul.f32 %v2879_v48, %v1588_v32 }
 0x60e   :  { %v1584_v34 = vadd.f32 %v1583_v52, %v3049_v43 }
 0x610   :  { %2880 = vtanh.f32 %v1584_v34 }
 0x61a   :  { %v2881_v56 = vpop.eup %2880 }
 0x61b   :  { %v1587_v57 = vmul.f32 %v2881_v56, %v1586_v55 }
 0x61d   :  { %v3224_v59 = vadd.f32 %v1590_v58, %v1587_v57 }
 0x61f   :  { %v1593_v60 = vrot.slane %v3224_v59, 4 }
 0x621   :  { %2610 = vmatmul.mubr.msk.f32.vlgmr.msra.gmra.mrb[18].mxu0 %vm384_vm3, %v1593_v60  ;;  %2621 = vmatmul.mubr.msk.f32.vlgmr.msra.gmra.mrb[24].mxu1 %vm384_vm3, %v1593_v60 }
 0x622   :  { %2785 = vmatpush3.bf16.msra.mxu0 %v3067_v63  ;;  %2631 = vmatprep.mubr.msk.f32.mxu0 %vm2903_vm2, %v2904_v20 }
 0x623   :  { %2786 = vmatprep.subr.bf16.mxu0 %v2902_v12  ;;  %2791 = vmatpush3.bf16.msra.mxu1 %v2985_v9  ;;  %v2077_v9 = vld [vmem:[%s3335_s4] sm:$0xff] }
 0x624   :  { %2792 = vmatprep.subr.bf16.mxu1 %v2902_v12  ;;  %2642 = vmatprep.mubr.msk.f32.mxu1 %vm2903_vm2, %v2904_v20 }
 0x626   :  { %2788 = vmatpush3.bf16.msra.mxu0 %v3082_v3 }
 0x627   :  { %2795 = vmatprep.subr.bf16.mxu0 %v2902_v12  ;;  %2794 = vmatpush3.bf16.msra.mxu1 %v3006_v16  ;;  %v2078_v16 = vld [vmem:[%s3335_s4 + $0x8] sm:$0xff] }
 0x628   :  { %2801 = vmatprep.subr.bf16.mxu1 %v2902_v12  ;;  %v2807_v43 = vpack.c.bf16 %v2078_v16, %v2077_v9 }
 0x629   :  { %2632 = vmatmul.mubr.msk.f32.vlgmr.msra.gmra.mrb[20].mxu0 %vm384_vm3, %v1593_v60 }
 0x62a   :  { %2797 = vmatpush3.bf16.msra.mxu0 %v2995_v13  ;;  %2653 = vmatprep.mubr.msk.f32.mxu0 %vm2903_vm2, %v2904_v20 }
 0x62b   :  { %2798 = vmatprep.subr.bf16.mxu0 %v2902_v12 }
 0x62e   :  { %2800 = vmatpush3.bf16.msra.mxu0 %v3015_v19 }
 0x62f   :  { %2808 = vmatprep.subr.bf16.mxu0 %v2807_v43 }
 0x6f4   :  { %v1662_v61 = vpop.f32.mrb[18].mxu0  ;;  %v1732_v62 = vpop.f32.mrb[24].mxu1 }
 0x6f5   :  { %v1736_v13 = vadd.f32 %v1662_v61, %v3036_v30  ;;  %v2611_v1 = vpop.f32.mrb[19].mxu0  ;;  %v2622_v2 = vpop.f32.mrb[25].mxu1  ;;  %v1743_v5 = vadd.f32 %v1732_v62, %v3051_v46 }
 0x6f7   :  { %v2271_v4 = vmul.f32 -1.442695, %v1736_v13  ;;  %v2272_v19 = vmul.f32 -1.442695, %v1743_v5 }
 0x6f9   :  { %2882 = vpow2.f32 %v2271_v4 }
 0x6fa   :  { %2884 = vpow2.f32 %v2272_v19 }
 0x6fc   :  { %v1816_v6 = vpop.f32.mrb[20].mxu0 }
 0x6fd   :  { %v2633_v7 = vpop.f32.mrb[21].mxu0  ;;  %v1817_v17 = vadd.f32 %v3058_v53, %v1816_v6 }
 0x703   :  { %v2883_v8 = vpop.eup %2882 }
 0x704   :  { %v1740_v10 = vadd.f32 1.0, %v2883_v8  ;;  %v2885_v11 = vpop.eup %2884 }
 0x705   :  { %v1747_v15 = vadd.f32 1.0, %v2885_v11 }
 0x706   :  { %2886 = vrcp.f32 %v1740_v10 }
 0x707   :  { %2888 = vrcp.f32 %v1747_v15 }
 0x710   :  { %v2887_v18 = vpop.eup %2886 }
 0x711   :  { %v1820_v21 = vmul.f32 %v2887_v18, %v1817_v17  ;;  %v2889_v24 = vpop.eup %2888 }
 0x712   :  { %v1823_v27 = vsub.f32 1.0, %v2889_v24  ;;  %v1826_v31 = vmul.f32 %v2889_v24, %v1593_v60 }
 0x713   :  { %v1821_v22 = vadd.f32 %v1820_v21, %v3047_v40 }
 0x715   :  { %2890 = vtanh.f32 %v1821_v22 }
 0x71f   :  { %v2891_v28 = vpop.eup %2890 }
 0x720   :  { %v1824_v29 = vmul.f32 %v2891_v28, %v1823_v27 }
 0x722   :  { %v3263_v25 = vadd.f32 %v1826_v31, %v1824_v29 }
 0x724   :  { %2643 = vmatmul.mubr.msk.f32.vlgmr.msra.gmra.mrb[26].mxu1 %vm384_vm3, %v3263_v25  ;;  %2654 = vmatmul.mubr.msk.f32.vlgmr.msra.gmra.mrb[22].mxu0 %vm384_vm3, %v3263_v25  ;;  %v2069_v16 = vrot.slane %v3263_v25, 4 }
 0x725   :  { %2803 = vmatpush3.bf16.msra.mxu1 %v3067_v63  ;;  %2810 = vmatpush3.bf16.msra.mxu0 %v2807_v43  ;;  %v2074_v63 = vsel %vm66_vm0, %v3134_v14, %v3165_v54 }
 0x726   :  { %2675 = vmatprep.mubr.msk.f32.mxu0 %vm384_vm3, %v2073_v37  ;;  %2804 = vmatprep.subr.bf16.mxu1 %v2902_v12  ;;  %v2075_v12 = vsel %vm66_vm0, %v3193_v26, %v3224_v59 }
 0x727   :  { %2812 = vmatprep.subr.bf16.mxu0 %v2811_v36  ;;  %2664 = vmatprep.mubr.msk.f32.mxu1 %vm2903_vm2, %v2904_v20 }
 0x729   :  { %2806 = vmatpush3.bf16.msra.mxu1 %v3082_v3  ;;  %2814 = vmatpush3.bf16.msra.mxu0 %v2811_v36 }
 0x72c   :  { %2665 = vmatmul.mubr.msk.f32.vlgmr.msra.gmra.mrb[28].mxu1 %vm384_vm3, %v3263_v25  ;;  %2676 = vmatmul.mubr.msk.f32.vlgmr.msra.gmra.mrb[24].mxu0 %vm384_vm3, %v2074_v63 }
 0x72d   :  { %2678 = vmatprep.mubr.msk.f32.mxu0 %vm384_vm3, %v2075_v12 }
 0x7f7   :  { %v1897_v0 = vpop.f32.mrb[26].mxu1  ;;  %v1967_v20 = vpop.f32.mrb[22].mxu0 }
 0x7f8   :  { %v1972_v44 = vrot.slane %v1897_v0, 4  ;;  %v2644_v3 = vpop.f32.mrb[27].mxu1  ;;  %v2655_v39 = vpop.f32.mrb[23].mxu0  ;;  %v1982_v41 = vrot.slane %v1967_v20, 4 }
 0x7fa   :  { %v1974_v42 = vadd.f32 %v1972_v44, %v3036_v30  ;;  %v1984_v54 = vadd.f32 %v1982_v41, %v3051_v46 }
 0x7fc   :  { %v2276_v14 = vmul.f32 -1.442695, %v1974_v42  ;;  %v2277_v50 = vmul.f32 -1.442695, %v1984_v54 }
 0x7fe   :  { %2892 = vpow2.f32 %v2276_v14 }
 0x7ff   :  { %v2057_v23 = vpop.f32.mrb[28].mxu1  ;;  %v2677_v26 = vpop.f32.mrb[24].mxu0  ;;  %2894 = vpow2.f32 %v2277_v50 }
 0x800   :  { %v2172_v38 = vadd.f32 %v2677_v26, %v2279_v45  ;;  %v2666_v47 = vpop.f32.mrb[29].mxu1  ;;  %v2166_v49 = vpop.f32.mrb[25].mxu0  ;;  %v2058_v55 = vadd.f32 %v3058_v53, %v2057_v23 }
 0x801   :  { %v2167_v51 = vadd.f32 %v2279_v45, %v2166_v49 }
 0x802   :  { %v2190_v52 = vcombine.high %v2172_v38, %v2172_v38  ;;  %2200 = vst.msk [vmem:[%s3337_s6 + $0x8] sm:$0xf] %vm2197_vm4, %v2172_v38  ;;  %v2062_v56 = vrot.slane %v2058_v55, 4 }
 0x803   :  { %v2189_v30 = vcombine.high %v2167_v51, %v2167_v51  ;;  %2198 = vst.msk [vmem:[%s3337_s6] sm:$0xf] %vm2197_vm4, %v2167_v51 }
 0x804   :  { %2201 = vst.msk [vmem:[%s3337_s6 + $0xc] sm:$0xf] %vm2197_vm4, %v2190_v52 }
 0x805   :  { %2199 = vst.msk [vmem:[%s3337_s6 + $0x4] sm:$0xf] %vm2197_vm4, %v2189_v30 }
 0x808   :  { %v2893_v46 = vpop.eup %2892 }
 0x809   :  { %v1978_v34 = vadd.f32 1.0, %v2893_v46  ;;  %v2895_v48 = vpop.eup %2894 }
 0x80a   :  { %v1988_v32 = vadd.f32 1.0, %v2895_v48 }
 0x80b   :  { %2896 = vrcp.f32 %v1978_v34 }
 0x80c   :  { %2898 = vrcp.f32 %v1988_v32 }
 0x815   :  { %v2897_v57 = vpop.eup %2896 }
 0x816   :  { %v2064_v58 = vmul.f32 %v2897_v57, %v2062_v56  ;;  %v2899_v60 = vpop.eup %2898 }
 0x817   :  { %v2067_v9 = vsub.f32 1.0, %v2899_v60  ;;  %v2071_v62 = vmul.f32 %v2899_v60, %v2069_v16 }
 0x818   :  { %v2065_v59 = vadd.f32 %v2064_v58, %v3047_v40 }
 0x81a   :  { %2900 = vtanh.f32 %v2065_v59 }
 0x824   :  { %v2901_v43 = vpop.eup %2900 }
 0x825   :  { %v2068_v61 = vmul.f32 %v2901_v43, %v2067_v9 }
 0x827   :  { %v2072_v13 = vadd.f32 %v2071_v62, %v2068_v61 }
 0x829   :  { %v2076_v1 = vsel %vm66_vm0, %v3263_v25, %v2072_v13 }
 0x82a   :  { %2679 = vmatmul.mubr.msk.f32.gmra.mrb[26].mxu0 %vm384_vm3, %v2076_v1 }
 0x8fd   :  { %v2680_v53 = vpop.f32.mrb[26].mxu0 }
 0x8fe   :  { %v2182_v2 = vadd.f32 %v2680_v53, %v2279_v45  ;;  %v2176_v4 = vpop.f32.mrb[27].mxu0 }
 0x8ff   :  { %v2177_v5 = vadd.f32 %v2279_v45, %v2176_v4 }
 0x900   :  { %v2192_v19 = vcombine.high %v2182_v2, %v2182_v2  ;;  %2204 = vst.msk [vmem:[%s3337_s6 + $0x18] sm:$0xf] %vm2197_vm4, %v2182_v2 }
 0x901   :  { %v2191_v40 = vcombine.high %v2177_v5, %v2177_v5  ;;  %2202 = vst.msk [vmem:[%s3337_s6 + $0x10] sm:$0xf] %vm2197_vm4, %v2177_v5 }
 0x902   :  { %2205 = vst.msk [vmem:[%s3337_s6 + $0x1c] sm:$0xf] %vm2197_vm4, %v2192_v19 }
 0x903   :  { %2203 = vst.msk [vmem:[%s3337_s6 + $0x14] sm:$0xf] %vm2197_vm4, %v2191_v40 }

</bundles_post_ra>
